<compile_context>
chip_gen: v5e
topology: v5e:2x2
jax: 0.10.0
libtpu: 0.0.40
codegen_flags: <defaults>
</compile_context>

<pallas_src>
import functools

import jax
import jax.numpy as jnp
from jax.experimental import pallas as pl
from jax.experimental.pallas import tpu as pltpu


def _round_up(n, m):
    return ((n + m - 1) // m) * m


def _epilogue(h, p_ref, o_ref, *, d_real, n_pad, eps, norm, activation, prelu_slope):
    """h: [tm, n_pad] f32 accumulator. p_ref rows: 0=bias, 1=gamma, 2=beta."""
    h = h + p_ref[0:1, :]                                   # bias add in f32 (VPU)

    if norm == "ln":
        # GroupNorm(1, d_real) on [B, d_real] == per-row LayerNorm over the real
        # features. Padded weight columns / bias entries are exactly 0, so h == 0
        # there and sum(h) over n_pad equals sum over the d_real real columns.
        inv_d = 1.0 / d_real
        mu = jnp.sum(h, axis=-1, keepdims=True) * inv_d
        diff = h - mu
        ss = jnp.sum(diff * diff, axis=-1, keepdims=True)
        if n_pad != d_real:
            # Padded columns contribute (0 - mu)^2 = mu^2 each; subtract algebraically
            # instead of materializing an iota + select mask.
            ss = ss - float(n_pad - d_real) * (mu * mu)
        y = diff * jax.lax.rsqrt(ss * inv_d + eps)           # rsqrt -> EUP
        # Padded gamma/beta entries are 0 -> padded output columns are exactly 0.
        y = y * p_ref[1:2, :] + p_ref[2:3, :]
    else:  # norm == 'none'
        y = h

    if activation == "relu":
        y = jnp.maximum(y, 0.0)
    elif activation == "lrelu":
        y = jnp.where(y >= 0.0, y, 0.01 * y)
    elif activation == "prelu":
        # TODO(synk): PReLU slope is learnable in PyTorch; compiled here as a static
        # constant (init=0.25) rather than a traced kernel input.
        y = jnp.where(y >= 0.0, y, prelu_slope * y)
    elif activation == "tanh":
        y = jnp.tanh(y)
    elif activation == "sigmoid":
        y = jax.nn.sigmoid(y)
    elif activation in ("none", None):
        pass
    else:
        raise ValueError(f"unknown activation: {activation}")

    o_ref[...] = y.astype(o_ref.dtype)


def _linear_block_kernel(x_ref, w_ref, p_ref, o_ref, acc_ref, *, nk, d_real, n_pad,
                         eps, norm, activation, prelu_slope):
    epi = functools.partial(_epilogue, p_ref=p_ref, o_ref=o_ref, d_real=d_real,
                            n_pad=n_pad, eps=eps, norm=norm, activation=activation,
                            prelu_slope=prelu_slope)
    if nk == 1:
        # Un-tiled K: single MXU matmul straight into the epilogue (no acc round-trip).
        epi(jnp.dot(x_ref[...], w_ref[...], preferred_element_type=jnp.float32))
    else:
        k = pl.program_id(1)

        @pl.when(k == 0)
        def _():
            acc_ref[...] = jnp.zeros_like(acc_ref)

        acc_ref[...] += jnp.dot(x_ref[...], w_ref[...],
                                preferred_element_type=jnp.float32)

        @pl.when(k == nk - 1)
        def _():
            epi(acc_ref[...])


def prepare_params(params, *, use_bf16=True):
    """One-time pad/cast of parameters to TPU-friendly tiles (hoisted out of forward).

    params: w [in, out] (transpose of PyTorch nn.Linear layout), b [out],
            gamma [out], beta [out] (gamma/beta optional for norm='none')."""
    w, b = params["w"], params["b"]
    d_in, d_out = w.shape
    k_pad = _round_up(d_in, 128)
    n_pad = _round_up(d_out, 128)
    mxu_dtype = jnp.bfloat16 if use_bf16 else jnp.float32

    w_p = jnp.pad(w, ((0, k_pad - d_in), (0, n_pad - d_out))).astype(mxu_dtype)

    gamma = params.get("gamma")
    beta = params.get("beta")
    if gamma is None:
        gamma = jnp.ones((d_out,), jnp.float32)
    if beta is None:
        beta = jnp.zeros((d_out,), jnp.float32)
    # One packed (3, n_pad) f32 array: row 0 = bias, 1 = gamma, 2 = beta.
    pbg = jnp.pad(jnp.stack([b, gamma, beta]).astype(jnp.float32),
                  ((0, 0), (0, n_pad - d_out)))

    return {"w_p": w_p, "pbg": pbg, "d_in": d_in, "d_out": d_out,
            "k_pad": k_pad, "n_pad": n_pad}


def linear_block_forward(x, prep, *, norm="ln", activation="relu", eps=1e-5,
                         block_m=256, block_k=512, out_dtype=jnp.float32,
                         prelu_slope=0.25):
    """x: [B, input_dim] float32. prep: output of prepare_params()."""
    B, d_in = x.shape
    assert d_in == prep["d_in"]
    d_out, k_pad, n_pad = prep["d_out"], prep["k_pad"], prep["n_pad"]
    w_p, pbg = prep["w_p"], prep["pbg"]
    mxu_dtype = w_p.dtype

    # Batch tile: fill the 256-wide MXU when B is large, clamp to sublane multiple.
    tm = min(block_m, _round_up(B, 8))
    b_pad = _round_up(B, tm)
    # K tile: largest multiple of 128 dividing k_pad, capped at block_k.
    tk = min(block_k, k_pad)
    while k_pad % tk:
        tk -= 128
    nk = k_pad // tk

    # Only the activations are padded/cast per call.
    x_p = jnp.pad(x, ((0, b_pad - B), (0, k_pad - d_in))).astype(mxu_dtype)

    kernel = functools.partial(
        _linear_block_kernel, nk=nk, d_real=d_out, n_pad=n_pad, eps=eps,
        norm=norm, activation=activation, prelu_slope=prelu_slope)

    # Constant-index operands need no double buffering (single DMA, stays resident).
    w_buf = 1 if nk == 1 else 2
    in_bytes = jnp.dtype(mxu_dtype).itemsize
    out_bytes = jnp.dtype(out_dtype).itemsize
    est = (tm * tk * in_bytes * 2            # x tile, double-buffered
           + tk * n_pad * in_bytes * w_buf   # weight panel
           + 8 * n_pad * 4                   # packed params (sublane-padded), 1 buffer
           + tm * n_pad * out_bytes * 2      # output tile, double-buffered
           + tm * n_pad * 4)                 # f32 accumulator scratch
    # Generous headroom, but stay below v7x's 64 MiB/TC physical VMEM.
    vmem_limit = int(min(max(2 * est + (2 << 20), 32 << 20), 60 << 20))

    out_pad = pl.pallas_call(
        kernel,
        out_shape=jax.ShapeDtypeStruct((b_pad, n_pad), out_dtype),
        grid_spec=pltpu.PrefetchScalarGridSpec(
            num_scalar_prefetch=0,
            grid=(b_pad // tm, nk),
            in_specs=[
                pl.BlockSpec((tm, tk), lambda i, k: (i, k)),        # activations
                pl.BlockSpec((tk, n_pad), lambda i, k: (k, 0),       # weight panel
                             pipeline_mode=pl.Buffered(w_buf)),
                pl.BlockSpec((3, n_pad), lambda i, k: (0, 0),        # bias/gamma/beta
                             pipeline_mode=pl.Buffered(1)),
            ],
            out_specs=pl.BlockSpec((tm, n_pad), lambda i, k: (i, 0)),
            scratch_shapes=[pltpu.VMEM((tm, n_pad), jnp.float32)],
        ),
        compiler_params=pltpu.CompilerParams(
            # Batch tiles shard across TensorCores; K is a serial reduction.
            # TODO(synk): for small-batch / huge-d_out shapes on v7x, an N-panel
            # "parallel" axis would keep both TCs busy, but LayerNorm-over-features
            # would then need a two-pass normalization.
            dimension_semantics=("parallel", "arbitrary"),
            vmem_limit_bytes=vmem_limit,
        ),
    )(x_p, w_p, pbg)

    if b_pad == B and n_pad == d_out:
        return out_pad                       # no padding added -> no slice/copy pass
    return out_pad[:B, :d_out]


def init_params(key, input_dim, output_dim):
    """Mirror nn.Linear uniform(-1/sqrt(fan_in), 1/sqrt(fan_in)) + GroupNorm affine init."""
    kw, kb = jax.random.split(key)
    bound = 1.0 / (input_dim ** 0.5)
    w = jax.random.uniform(kw, (input_dim, output_dim), jnp.float32, -bound, bound)
    b = jax.random.uniform(kb, (output_dim,), jnp.float32, -bound, bound)
    gamma = jnp.ones((output_dim,), jnp.float32)
    beta = jnp.zeros((output_dim,), jnp.float32)
    return {"w": w, "b": b, "gamma": gamma, "beta": beta}


if __name__ == "__main__":
    key = jax.random.PRNGKey(0)
    kx, kp = jax.random.split(key)

    B, input_dim, output_dim = 2, 64, 32   # LinearBlock(64, 32, norm='ln', activation='relu')
    x = jax.random.normal(kx, (B, input_dim), jnp.float32)
    params = init_params(kp, input_dim, output_dim)

    # One-time parameter prep (hoisted out of the per-call path).
    prep = prepare_params(params, use_bf16=True)

    out = jax.block_until_ready(
        linear_block_forward(x, prep, norm="ln", activation="relu"))

    # Reference: same bf16-in / f32-accumulate compute path in plain JAX.
    h = jnp.dot(x.astype(jnp.bfloat16), params["w"].astype(jnp.bfloat16),
                preferred_element_type=jnp.float32) + params["b"]
    mu = jnp.mean(h, axis=-1, keepdims=True)
    var = jnp.mean((h - mu) ** 2, axis=-1, keepdims=True)
    y = (h - mu) * jax.lax.rsqrt(var + 1e-5)
    y = y * params["gamma"] + params["beta"]
    ref = jnp.maximum(y, 0.0)

    assert out.shape == (B, output_dim)
    assert jnp.allclose(out, ref, atol=2e-3, rtol=2e-3), float(jnp.max(jnp.abs(out - ref)))
    print("KERNEL_OK")
</pallas_src>

<mosaic_0001>
module attributes {stable_mosaic.version = 11 : i64} {
  func.func @_linear_block_kernel(%arg0: i32, %arg1: i32, %arg2: memref<8x128xbf16, #tpu.memory_space<vmem>>, %arg3: memref<128x128xbf16, #tpu.memory_space<vmem>>, %arg4: memref<3x128xf32, #tpu.memory_space<vmem>>, %arg5: memref<8x128xf32, #tpu.memory_space<vmem>>, %arg6: memref<8x128xf32, #tpu.memory_space<vmem>>) attributes {dimension_semantics = [#tpu.dimension_semantics<parallel>, #tpu.dimension_semantics<arbitrary>], iteration_bounds = array<i64: 1, 1>, scalar_prefetch = 0 : i64, scratch_operands = 1 : i64, tpu.core_type = #tpu.core_type<tc>, window_params = [{transform_indices = @transform_0, window_bounds = array<i64: 8, 128>}, {pipeline_mode = #tpu.pipeline_mode<synchronous>, transform_indices = @transform_1, window_bounds = array<i64: 128, 128>}, {pipeline_mode = #tpu.pipeline_mode<synchronous>, transform_indices = @transform_2, window_bounds = array<i64: 3, 128>}, {transform_indices = @transform_3, window_bounds = array<i64: 8, 128>}]} {
    %c0 = arith.constant 0 : index
    %c0_0 = arith.constant 0 : index
    %0 = vector.load %arg2[%c0, %c0_0] : memref<8x128xbf16, #tpu.memory_space<vmem>>, vector<8x128xbf16>
    %c0_1 = arith.constant 0 : index
    %c0_2 = arith.constant 0 : index
    %1 = vector.load %arg3[%c0_1, %c0_2] : memref<128x128xbf16, #tpu.memory_space<vmem>>, vector<128x128xbf16>
    %cst = arith.constant dense<0.000000e+00> : vector<8x128xf32>
    %2 = tpu.matmul %0, %1, %cst {dimension_numbers = #tpu.dot_dimension_numbers<[1], [0], [0], [1], [0, 0, 1, 1], [], []>} : vector<8x128xbf16>, vector<128x128xbf16>, vector<8x128xf32> -> vector<8x128xf32>
    %c0_3 = arith.constant 0 : index
    %c0_4 = arith.constant 0 : index
    %3 = vector.load %arg4[%c0_3, %c0_4] : memref<3x128xf32, #tpu.memory_space<vmem>>, vector<1x128xf32>
    %4 = vector.broadcast %3 : vector<1x128xf32> to vector<8x128xf32>
    %5 = arith.addf %2, %4 : vector<8x128xf32>
    %cst_5 = arith.constant dense<0.000000e+00> : vector<8xf32>
    %6 = vector.multi_reduction <add>, %5, %cst_5 [1] : vector<8x128xf32> to vector<8xf32>
    %7 = vector.shape_cast %6 : vector<8xf32> to vector<8x1xf32>
    %cst_6 = arith.constant 3.125000e-02 : f32
    %8 = vector.broadcast %cst_6 : f32 to vector<8x1xf32>
    %9 = arith.mulf %7, %8 : vector<8x1xf32>
    %10 = vector.broadcast %9 : vector<8x1xf32> to vector<8x128xf32>
    %11 = arith.subf %5, %10 : vector<8x128xf32>
    %12 = arith.mulf %11, %11 : vector<8x128xf32>
    %cst_7 = arith.constant dense<0.000000e+00> : vector<8xf32>
    %13 = vector.multi_reduction <add>, %12, %cst_7 [1] : vector<8x128xf32> to vector<8xf32>
    %14 = vector.shape_cast %13 : vector<8xf32> to vector<8x1xf32>
    %15 = arith.mulf %9, %9 : vector<8x1xf32>
    %cst_8 = arith.constant 9.600000e+01 : f32
    %16 = vector.broadcast %cst_8 : f32 to vector<8x1xf32>
    %17 = arith.mulf %16, %15 : vector<8x1xf32>
    %18 = arith.subf %14, %17 : vector<8x1xf32>
    %cst_9 = arith.constant 3.125000e-02 : f32
    %19 = vector.broadcast %cst_9 : f32 to vector<8x1xf32>
    %20 = arith.mulf %18, %19 : vector<8x1xf32>
    %cst_10 = arith.constant 9.99999974E-6 : f32
    %21 = vector.broadcast %cst_10 : f32 to vector<8x1xf32>
    %22 = arith.addf %20, %21 : vector<8x1xf32>
    %23 = math.rsqrt %22 : vector<8x1xf32>
    %24 = vector.broadcast %23 : vector<8x1xf32> to vector<8x128xf32>
    %25 = arith.mulf %11, %24 : vector<8x128xf32>
    %c1 = arith.constant 1 : index
    %c0_11 = arith.constant 0 : index
    %26 = vector.load %arg4[%c1, %c0_11] : memref<3x128xf32, #tpu.memory_space<vmem>>, vector<1x128xf32>
    %27 = vector.broadcast %26 : vector<1x128xf32> to vector<8x128xf32>
    %28 = arith.mulf %25, %27 : vector<8x128xf32>
    %c2 = arith.constant 2 : index
    %c0_12 = arith.constant 0 : index
    %29 = vector.load %arg4[%c2, %c0_12] : memref<3x128xf32, #tpu.memory_space<vmem>>, vector<1x128xf32>
    %30 = vector.broadcast %29 : vector<1x128xf32> to vector<8x128xf32>
    %31 = arith.addf %28, %30 : vector<8x128xf32>
    %cst_13 = arith.constant 0.000000e+00 : f32
    %32 = vector.broadcast %cst_13 : f32 to vector<8x128xf32>
    %33 = arith.maximumf %31, %32 : vector<8x128xf32>
    %c0_14 = arith.constant 0 : index
    %c0_15 = arith.constant 0 : index
    %34 = vector.load %arg5[%c0_14, %c0_15] : memref<8x128xf32, #tpu.memory_space<vmem>>, vector<8x128xf32>
    tpu.vector_store %arg5[%c0_14, %c0_15], %33 {strides = array<i32>} : memref<8x128xf32, #tpu.memory_space<vmem>>, vector<8x128xf32>,
    return
  }
  func.func @transform_0(%arg0: i32, %arg1: i32) -> (i32, i32) {
    %c0_i32 = arith.constant 0 : i32
    return %arg0, %arg1 : i32, i32
  }
  func.func @transform_1(%arg0: i32, %arg1: i32) -> (i32, i32) {
    %c0_i32 = arith.constant 0 : i32
    %c0_i32_0 = arith.constant 0 : i32
    return %arg1, %c0_i32 : i32, i32
  }
  func.func @transform_2(%arg0: i32, %arg1: i32) -> (i32, i32) {
    %c0_i32 = arith.constant 0 : i32
    %c0_i32_0 = arith.constant 0 : i32
    %c0_i32_1 = arith.constant 0 : i32
    return %c0_i32, %c0_i32_0 : i32, i32
  }
  func.func @transform_3(%arg0: i32, %arg1: i32) -> (i32, i32) {
    %c0_i32 = arith.constant 0 : i32
    %c0_i32_0 = arith.constant 0 : i32
    return %arg0, %c0_i32 : i32, i32
  }
}

</mosaic_0001>

<bundles_post_ra>
// kernel: tpu_custom_call.1
= control target key start
LH: loop header
LB: loop body
LE: loop exit
PB: predicated region body
PF: predicated region fallthrough
CT: control target
= control target key end

     0   :  { %8 = vsyncpa [#allocation4], 0  ;;  %s378_s0 = inlined_call_operand.hbm [shape: bf16[8,128], index: 0, kind: input, shape index: {}]   ;;  %s379_s1 = inlined_call_operand.hbm [shape: bf16[128,128], index: 1, kind: input, shape index: {}]   ;;  %s380_s2 = inlined_call_operand.hbm [shape: f32[3,128], index: 2, kind: input, shape index: {}]   ;;  %s381_s3 = inlined_call_operand.hbm [shape: f32[8,128], index: 3, kind: output, shape index: {}]  }
   0x1   :  { %9 = vsyncpa [#allocation7], 0  ;;  %s26_s14 = sshll.u32 %s379_s1, 4  ;;  %s27_s14 = int_to_ptr.hbm [resolvable:$true] %s26_s14 }
   0x2   :  { %10 = vsyncpa [#allocation5], 0  ;;  %s340_s15 = smov [#allocation6]   ;;  %s16_s19 = sshll.u32 %s378_s0, 4  ;;  %s17_s19 = int_to_ptr.hbm [resolvable:$true] %s16_s19 }
   0x3   :  { %s28_s16 = sshll.u32 %s340_s15, 4  ;;  %s341_s20 = smov 64   ;;  %s29_s16 = int_to_ptr.vmem [resolvable:$true] %s28_s16 }
   0x4   :  { %s342_s21 = smov 4   ;;  %s343_s22 = smov [#allocation3]  }
   0x5   :  { %34 = dma.hbm_to_vmem [thread:$0]  %s27_s14, 1024, %s29_s16, [#allocation7], %s341_s20, %s341_s20, %s342_s21  }
   0x6   :  { %s18_s23 = sshll.u32 %s343_s22, 4  ;;  %s40_s26 = sshll.u32 %s380_s2, 4  ;;  %s19_s23 = int_to_ptr.vmem [resolvable:$true] %s18_s23  ;;  %s41_s26 = int_to_ptr.hbm [resolvable:$true] %s40_s26 }
   0x7   :  { %21 = dma.hbm_to_vmem [thread:$0]  %s17_s19, 64, %s19_s23, [#allocation4]  }
   0x8   :  { %s344_s1 = smov [#allocation8]  }
   0x9   :  { %s42_s27 = sshll.u32 %s344_s1, 4  ;;  %s43_s27 = int_to_ptr.vmem [resolvable:$true] %s42_s27 }
   0xa   :  { %45 = dma.hbm_to_vmem [thread:$0]  %s41_s26, 64, %s43_s27, [#allocation7]  }
   0xb   :  { %334 = dma.done.wait [#allocation4], 64  }
   0xc   :  { %335 = vsyncadd [#allocation4], 4294967232 }
   0xd   :  { %336 = dma.done.wait [#allocation7], 1088  }
   0xe   :  { %337 = vsyncadd [#allocation7], 4294966208  ;;  %v226_v0 = vld [vmem:[#allocation6 + $0x38] sm:$0xff]  ;;  %v225_v1 = vld [vmem:[#allocation6 + $0x30] sm:$0xff]  ;;  %s345_s0 = smov [#allocation9]   ;;  %s176_s30 = sshll.u32 %s381_s3, 4  ;;  %s177_s30 = int_to_ptr.hbm [resolvable:$true] %s176_s30 }
   0xf   :  { %125 = vmatpush.bf16.msra.mxu0 %v226_v0  ;;  %v224_v2 = vld [vmem:[#allocation6 + $0x28] sm:$0xff]  ;;  %v223_v3 = vld [vmem:[#allocation6 + $0x20] sm:$0xff]  ;;  %v222_v4 = vld [vmem:[#allocation6 + $0x18] sm:$0xff]  ;;  %s174_s2 = sshll.u32 %s345_s0, 4  ;;  %s175_s2 = int_to_ptr.vmem [resolvable:$true] %s174_s2 }
  0x10   :  { %v221_v5 = vld [vmem:[#allocation6 + $0x10] sm:$0xff]  ;;  %v220_v6 = vld [vmem:[#allocation6 + $0x8] sm:$0xff]  ;;  %v219_v7 = vld [vmem:[#allocation6] sm:$0xff] }
  0x11   :  { %v58_v8 = vld [vmem:[#allocation3] sm:$0xf]  ;;  %v233_v9 = vld [vmem:[#allocation8] ss:$0 sm:$0xff]  ;;  %v234_v29 = vld [vmem:[#allocation8 + $0x1] ss:$0 sm:$0xff] }
  0x12   :  { %v235_v32 = vld [vmem:[#allocation8 + $0x2] ss:$0 sm:$0xff] }
  0x13   :  { %126 = vmatpush.bf16.msra.mxu0 %v225_v1 }
  0x17   :  { %127 = vmatpush.bf16.msra.mxu0 %v224_v2 }
  0x1b   :  { %128 = vmatpush.bf16.msra.mxu0 %v223_v3 }
  0x1f   :  { %129 = vmatpush.bf16.msra.mxu0 %v222_v4 }
  0x23   :  { %130 = vmatpush.bf16.msra.mxu0 %v221_v5 }
  0x27   :  { %131 = vmatpush.bf16.msra.mxu0 %v220_v6 }
  0x2b   :  { %132 = vmatpush.bf16.msra.mxu0 %v219_v7 }
  0x2e   :  { %133 = vmatmul.bf16.vlgmr.msra.gmra.mxu0 %v58_v8 }
  0xab   :  { %v134_v10 = vpop.f32.mrf.mxu0 }
  0xac   :  { %v135_v11 = vadd.f32 %v233_v9, %v134_v10 }
  0xae   :  { %138 = vadd.xlane.f32.xlu0 %v135_v11 }
  0xb3   :  { %v136_v12 = vpop.f32.mrf.mxu0 }
 0x121   :  { %v139_v13 = vpop.xlane.xlu0 %138 }
 0x122   :  { %v140_v14 = vmul.f32 0.03125, %v139_v13 }
 0x124   :  { %v141_v15 = vsub.f32 %v135_v11, %v140_v14  ;;  %v145_v17 = vmul.f32 %v140_v14, %v140_v14 }
 0x126   :  { %v142_v16 = vmul.f32 %v141_v15, %v141_v15  ;;  %v146_v18 = vmul.f32 96.0, %v145_v17 }
 0x128   :  { %143 = vadd.xlane.f32.xlu0 %v142_v16 }
 0x19b   :  { %v144_v19 = vpop.xlane.xlu0 %143 }
 0x19c   :  { %v147_v20 = vsub.f32 %v144_v19, %v146_v18 }
 0x19e   :  { %v148_v21 = vmul.f32 0.03125, %v147_v20 }
 0x1a0   :  { %v149_v22 = vadd.f32 1e-05, %v148_v21 }
 0x1a2   :  { %236 = vrsqrt.f32 %v149_v22  ;;  %vm156_vm1 = vweird.f32 %v149_v22 }
 0x1a8   :  { %v237_v23 = vpop.eup %236 }
 0x1a9   :  { %v151_v24 = vmul.f32 %v237_v23, %v149_v22  ;;  %vm157_vm0 = vweird.f32 %v237_v23 }
 0x1aa   :  { %vm158_vm2 = vmor %vm156_vm1, %vm157_vm0 }
 0x1ab   :  { %v152_v25 = vmul.f32 %v237_v23, %v151_v24 }
 0x1ad   :  { %v153_v26 = vmul.f32 0.5, %v152_v25 }
 0x1af   :  { %v154_v27 = vsub.f32 1.5, %v153_v26 }
 0x1b1   :  { %v155_v28 = vmul.f32 %v237_v23, %v154_v27 }
 0x1b3   :  { %v159_v30 = vsel %vm158_vm2, %v237_v23, %v155_v28 }
 0x1b4   :  { %v160_v31 = vmul.f32 %v159_v30, %v141_v15 }
 0x1b6   :  { %v163_v33 = vmul.f32 %v234_v29, %v160_v31 }
 0x1b8   :  { %v166_v34 = vadd.f32 %v235_v32, %v163_v33 }
 0x1ba   :  { %v167_v35 = vmax.f32 %v166_v34, 0.0 }
 0x1bc   :  { %168 = vst [vmem:[#allocation9] sm:$0xff] %v167_v35 }
 0x1bd   :  { %179 = dma.vmem_to_hbm [thread:$0]  %s175_s2, 128, %s177_s30, [#allocation5]  }
 0x1be   :  { %338 = dma.done.wait [#allocation5], 128  }
 0x1bf   :  { %339 = vsyncadd [#allocation5], 4294967168 }
 0x1c0   :  { %184 = vsyncpa [#allocation4], 1 }
 0x1c1   :  { %185 = vsyncpa [#allocation7], 1 }
 0x1c2   :  { %186 = vsyncpa [#allocation5], 1 }

</bundles_post_ra>
